<compile_context>
chip_gen: v5e
topology: v5e:2x2
jax: 0.10.0
libtpu: 0.0.40
codegen_flags: <defaults>
</compile_context>

<pallas_src>
import jax
import jax.numpy as jnp
from jax.experimental import pallas as pl
from jax.experimental.pallas import tpu as pltpu

LANES = 128


def query_network_kernel(mem_ref, q_ref, w_wt_ref, w_mlp_resp_ref, w_mlp_tq_ref,
                         b_mlp_ref, w_out_ref, b_out_ref, packed_ref):
    mem = mem_ref[...]                              # (TB, S, M) f32
    q = q_ref[...]                                  # (TB, 4C)   f32
    tb, s_len, m_dim = mem.shape

    # trans_query = relu(word_trans(query))         (Linear, bias=False)
    tq = jnp.dot(q, w_wt_ref[...], preferred_element_type=jnp.float32)   # (TB, M)
    tq = jnp.maximum(tq, 0.0)

    # attention = softmax(bmm(tq.unsqueeze(1), memory^T).squeeze(1))
    # batched MXU contraction: (B,1,M) x (B,S,M) -> (B,1,S)
    logits = jnp.einsum("bqm,bsm->bqs", tq[:, None, :], mem,
                        preferred_element_type=jnp.float32)              # (TB,1,S)
    logits = logits - jnp.max(logits, axis=-1, keepdims=True)
    e = jnp.exp(logits)
    inv_denom = pl.reciprocal(jnp.sum(e, axis=-1, keepdims=True), approx=False)
    att3 = e * inv_denom                                                 # (TB,1,S)

    # response = mean_S(attention * memory): (B,1,S) x (B,S,M) -> (B,1,M)
    resp = jnp.einsum("bqs,bsm->bqm", att3, mem,
                      preferred_element_type=jnp.float32)[:, 0, :] * (1.0 / s_len)
    att = att3[:, 0, :]                                                  # (TB, S)

    # mlp(cat(response, trans_query)) as a split matmul (w_mlp pre-split in wrapper)
    h = (jnp.dot(resp, w_mlp_resp_ref[...], preferred_element_type=jnp.float32)
         + jnp.dot(tq, w_mlp_tq_ref[...], preferred_element_type=jnp.float32)
         + b_mlp_ref[...])
    h = jnp.maximum(h, 0.0)
    out = jnp.dot(h, w_out_ref[...], preferred_element_type=jnp.float32) + b_out_ref[...]

    # Pack [out | resp | tq | att | zero-pad] -> one lane-dense (TB, 128k) store.
    pad = packed_ref.shape[-1] - (out.shape[-1] + 2 * m_dim + s_len)
    parts = [out, resp, tq, att]
    if pad > 0:
        parts.append(jnp.zeros((tb, pad), jnp.float32))
    packed_ref[...] = jnp.concatenate(parts, axis=-1)


def query_network(memory, query, w_wt, w_mlp, b_mlp, w_out, b_out, *, batch_tile=None):
    B, S, M = memory.shape
    QD = query.shape[-1]
    H = w_mlp.shape[-1]
    n_out = w_out.shape[-1]

    # Free layout plumbing done at trace time (not inside the kernel).
    w_mlp_resp = w_mlp[:M, :]
    w_mlp_tq = w_mlp[M:, :]
    b_mlp2 = b_mlp.reshape(1, H)
    b_out2 = b_out.reshape(1, n_out)

    payload = n_out + 2 * M + S
    pack = pl.cdiv(payload, LANES) * LANES          # lane-dense packed width

    # Batch tile: full batch for small B, otherwise 8-aligned tiles dividing B.
    if batch_tile is None:
        batch_tile = B if B <= 256 else 256
    if B % batch_tile != 0 or (batch_tile != B and batch_tile % 8 != 0):
        # TODO(synk): pad ragged batches instead of falling back to one tile.
        batch_tile = B
    grid = (B // batch_tile,)

    # VMEM budget: double-buffered I/O tiles + resident weights + headroom,
    # capped at 64 MiB so the same setting is valid on v7x as well as v5e/v6e.
    io_bytes = 2 * 4 * batch_tile * (S * M + QD + pack)
    w_bytes = 4 * (QD * M + 2 * M * H + H + H * n_out + n_out)
    vmem_limit = int(min(64 * 1024 * 1024,
                         max(2 * (io_bytes + w_bytes), 32 * 1024 * 1024)))

    grid_spec = pltpu.PrefetchScalarGridSpec(
        num_scalar_prefetch=0,
        grid=grid,
        in_specs=[
            pl.BlockSpec((batch_tile, S, M), lambda i: (i, 0, 0)),   # memory (batch-tiled)
            pl.BlockSpec((batch_tile, QD), lambda i: (i, 0)),        # query  (batch-tiled)
            pl.BlockSpec((QD, M), lambda i: (0, 0)),                 # w_wt       (resident)
            pl.BlockSpec((M, H), lambda i: (0, 0)),                  # w_mlp_resp (resident)
            pl.BlockSpec((M, H), lambda i: (0, 0)),                  # w_mlp_tq   (resident)
            pl.BlockSpec((1, H), lambda i: (0, 0)),                  # b_mlp      (resident)
            pl.BlockSpec((H, n_out), lambda i: (0, 0)),              # w_out      (resident)
            pl.BlockSpec((1, n_out), lambda i: (0, 0)),              # b_out      (resident)
        ],
        out_specs=pl.BlockSpec((batch_tile, pack), lambda i: (i, 0)),
    )

    packed = pl.pallas_call(
        query_network_kernel,
        out_shape=jax.ShapeDtypeStruct((B, pack), jnp.float32),
        grid_spec=grid_spec,
        compiler_params=pltpu.CompilerParams(
            dimension_semantics=("parallel",),      # megacore sharding on v7x
            vmem_limit_bytes=vmem_limit,
        ),
    )(memory, query, w_wt, w_mlp_resp, w_mlp_tq, b_mlp2, w_out, b_out2)

    out = packed[:, :n_out]
    resp = packed[:, n_out:n_out + M]
    tq = packed[:, n_out + M:n_out + 2 * M]
    att = packed[:, n_out + 2 * M:n_out + 2 * M + S]
    return out, resp, tq, att


if __name__ == "__main__":
    B, S = 2, 8
    conv_dim, mem_dim, mlp_dim = 8, 32, 32

    key = jax.random.PRNGKey(0)
    ks = jax.random.split(key, 7)
    memory = jax.random.normal(ks[0], (B, S, mem_dim), jnp.float32)
    query = jax.random.normal(ks[1], (B, 4 * conv_dim), jnp.float32)

    # PyTorch Linear params, stored pre-transposed as (in_features, out_features).
    w_wt = 0.1 * jax.random.normal(ks[2], (4 * conv_dim, mem_dim), jnp.float32)
    w_mlp = 0.1 * jax.random.normal(ks[3], (2 * mem_dim, mlp_dim), jnp.float32)
    b_mlp = 0.1 * jax.random.normal(ks[4], (mlp_dim,), jnp.float32)
    w_out = 0.1 * jax.random.normal(ks[5], (mlp_dim, 3), jnp.float32)
    b_out = 0.1 * jax.random.normal(ks[6], (3,), jnp.float32)

    out, resp, tq, att = query_network(memory, query, w_wt, w_mlp, b_mlp, w_out, b_out)
    jax.block_until_ready((out, resp, tq, att))

    # Plain-JAX reference (mirrors the torch forward exactly).
    tq_r = jnp.maximum(query @ w_wt, 0.0)
    logits_r = jnp.einsum("bm,bsm->bs", tq_r, memory)
    att_r = jax.nn.softmax(logits_r, axis=-1)
    resp_r = jnp.mean(att_r[:, :, None] * memory, axis=1)
    cat_r = jnp.concatenate([resp_r, tq_r], axis=-1)
    out_r = jnp.maximum(cat_r @ w_mlp + b_mlp[None, :], 0.0) @ w_out + b_out[None, :]

    assert jnp.allclose(tq, tq_r, atol=1e-4, rtol=1e-4), "trans_query mismatch"
    assert jnp.allclose(att, att_r, atol=1e-4, rtol=1e-4), "attention mismatch"
    assert jnp.allclose(resp, resp_r, atol=1e-4, rtol=1e-4), "response mismatch"
    assert jnp.allclose(out, out_r, atol=1e-3, rtol=1e-3), "output mismatch"
    print("KERNEL_OK")
</pallas_src>

<mosaic_0001>
module attributes {stable_mosaic.version = 11 : i64} {
  func.func @query_network_kernel(%arg0: i32, %arg1: memref<2x8x32xf32, #tpu.memory_space<vmem>>, %arg2: memref<2x32xf32, #tpu.memory_space<vmem>>, %arg3: memref<32x32xf32, #tpu.memory_space<vmem>>, %arg4: memref<32x32xf32, #tpu.memory_space<vmem>>, %arg5: memref<32x32xf32, #tpu.memory_space<vmem>>, %arg6: memref<1x32xf32, #tpu.memory_space<vmem>>, %arg7: memref<32x3xf32, #tpu.memory_space<vmem>>, %arg8: memref<1x3xf32, #tpu.memory_space<vmem>>, %arg9: memref<2x128xf32, #tpu.memory_space<vmem>>) attributes {dimension_semantics = [#tpu.dimension_semantics<parallel>], iteration_bounds = array<i64: 1>, scalar_prefetch = 0 : i64, scratch_operands = 0 : i64, tpu.core_type = #tpu.core_type<tc>, window_params = [{transform_indices = @transform_0, window_bounds = array<i64: 2, 8, 32>}, {transform_indices = @transform_1, window_bounds = array<i64: 2, 32>}, {pipeline_mode = #tpu.pipeline_mode<synchronous>, transform_indices = @transform_2, window_bounds = array<i64: 32, 32>}, {pipeline_mode = #tpu.pipeline_mode<synchronous>, transform_indices = @transform_3, window_bounds = array<i64: 32, 32>}, {pipeline_mode = #tpu.pipeline_mode<synchronous>, transform_indices = @transform_4, window_bounds = array<i64: 32, 32>}, {pipeline_mode = #tpu.pipeline_mode<synchronous>, transform_indices = @transform_5, window_bounds = array<i64: 1, 32>}, {pipeline_mode = #tpu.pipeline_mode<synchronous>, transform_indices = @transform_6, window_bounds = array<i64: 32, 3>}, {pipeline_mode = #tpu.pipeline_mode<synchronous>, transform_indices = @transform_7, window_bounds = array<i64: 1, 3>}, {transform_indices = @transform_8, window_bounds = array<i64: 2, 128>}]} {
    %c0 = arith.constant 0 : index
    %c0_0 = arith.constant 0 : index
    %c0_1 = arith.constant 0 : index
    %0 = vector.load %arg1[%c0, %c0_0, %c0_1] : memref<2x8x32xf32, #tpu.memory_space<vmem>>, vector<2x8x32xf32>
    %c0_2 = arith.constant 0 : index
    %c0_3 = arith.constant 0 : index
    %1 = vector.load %arg2[%c0_2, %c0_3] : memref<2x32xf32, #tpu.memory_space<vmem>>, vector<2x32xf32>
    %c0_4 = arith.constant 0 : index
    %c0_5 = arith.constant 0 : index
    %2 = vector.load %arg3[%c0_4, %c0_5] : memref<32x32xf32, #tpu.memory_space<vmem>>, vector<32x32xf32>
    %cst = arith.constant dense<0.000000e+00> : vector<2x32xf32>
    %3 = tpu.matmul %1, %2, %cst {dimension_numbers = #tpu.dot_dimension_numbers<[1], [0], [0], [1], [0, 0, 1, 1], [], []>} : vector<2x32xf32>, vector<32x32xf32>, vector<2x32xf32> -> vector<2x32xf32>
    %cst_6 = arith.constant 0.000000e+00 : f32
    %4 = vector.broadcast %cst_6 : f32 to vector<2x32xf32>
    %5 = arith.maximumf %3, %4 : vector<2x32xf32>
    %6 = vector.shape_cast %5 : vector<2x32xf32> to vector<2x1x32xf32>
    "tpu.trace_start"() <{level = 10 : i32, message = "bqm,bsm->bqs"}> : () -> ()
    %cst_7 = arith.constant dense<0.000000e+00> : vector<2x1x8xf32>
    %7 = tpu.matmul %6, %0, %cst_7 {dimension_numbers = #tpu.dot_dimension_numbers<[2], [2], [1], [1], [0, 0, 0, 1, 1, 1], [0], [0]>} : vector<2x1x32xf32>, vector<2x8x32xf32>, vector<2x1x8xf32> -> vector<2x1x8xf32>
    "tpu.trace_stop"() : () -> ()
    %cst_8 = arith.constant dense<0xFF800000> : vector<2x1xf32>
    %8 = vector.multi_reduction <maximumf>, %7, %cst_8 [2] : vector<2x1x8xf32> to vector<2x1xf32>
    %9 = vector.shape_cast %8 : vector<2x1xf32> to vector<2x1x1xf32>
    %10 = vector.broadcast %9 : vector<2x1x1xf32> to vector<2x1x8xf32>
    %11 = arith.subf %7, %10 : vector<2x1x8xf32>
    %12 = math.exp %11 : vector<2x1x8xf32>
    %cst_9 = arith.constant dense<0.000000e+00> : vector<2x1xf32>
    %13 = vector.multi_reduction <add>, %12, %cst_9 [2] : vector<2x1x8xf32> to vector<2x1xf32>
    %14 = vector.shape_cast %13 : vector<2x1xf32> to vector<2x1x1xf32>
    %15 = tpu.reciprocal %14 : vector<2x1x1xf32> -> vector<2x1x1xf32>
    %16 = vector.broadcast %15 : vector<2x1x1xf32> to vector<2x1x8xf32>
    %17 = arith.mulf %12, %16 : vector<2x1x8xf32>
    "tpu.trace_start"() <{level = 10 : i32, message = "bqs,bsm->bqm"}> : () -> ()
    %cst_10 = arith.constant dense<0.000000e+00> : vector<2x1x32xf32>
    %18 = tpu.matmul %17, %0, %cst_10 {dimension_numbers = #tpu.dot_dimension_numbers<[2], [1], [1], [2], [0, 0, 0, 1, 1, 2], [0], [0]>} : vector<2x1x8xf32>, vector<2x8x32xf32>, vector<2x1x32xf32> -> vector<2x1x32xf32>
    "tpu.trace_stop"() : () -> ()
    %19 = vector.shape_cast %18 : vector<2x1x32xf32> to vector<2x32xf32>
    %cst_11 = arith.constant 1.250000e-01 : f32
    %20 = vector.broadcast %cst_11 : f32 to vector<2x32xf32>
    %21 = arith.mulf %19, %20 : vector<2x32xf32>
    %22 = vector.shape_cast %17 : vector<2x1x8xf32> to vector<2x8xf32>
    %c0_12 = arith.constant 0 : index
    %c0_13 = arith.constant 0 : index
    %23 = vector.load %arg4[%c0_12, %c0_13] : memref<32x32xf32, #tpu.memory_space<vmem>>, vector<32x32xf32>
    %cst_14 = arith.constant dense<0.000000e+00> : vector<2x32xf32>
    %24 = tpu.matmul %21, %23, %cst_14 {dimension_numbers = #tpu.dot_dimension_numbers<[1], [0], [0], [1], [0, 0, 1, 1], [], []>} : vector<2x32xf32>, vector<32x32xf32>, vector<2x32xf32> -> vector<2x32xf32>
    %c0_15 = arith.constant 0 : index
    %c0_16 = arith.constant 0 : index
    %25 = vector.load %arg5[%c0_15, %c0_16] : memref<32x32xf32, #tpu.memory_space<vmem>>, vector<32x32xf32>
    %cst_17 = arith.constant dense<0.000000e+00> : vector<2x32xf32>
    %26 = tpu.matmul %5, %25, %cst_17 {dimension_numbers = #tpu.dot_dimension_numbers<[1], [0], [0], [1], [0, 0, 1, 1], [], []>} : vector<2x32xf32>, vector<32x32xf32>, vector<2x32xf32> -> vector<2x32xf32>
    %27 = arith.addf %24, %26 : vector<2x32xf32>
    %c0_18 = arith.constant 0 : index
    %c0_19 = arith.constant 0 : index
    %28 = vector.load %arg6[%c0_18, %c0_19] : memref<1x32xf32, #tpu.memory_space<vmem>>, vector<1x32xf32>
    %29 = vector.broadcast %28 : vector<1x32xf32> to vector<2x32xf32>
    %30 = arith.addf %27, %29 : vector<2x32xf32>
    %cst_20 = arith.constant 0.000000e+00 : f32
    %31 = vector.broadcast %cst_20 : f32 to vector<2x32xf32>
    %32 = arith.maximumf %30, %31 : vector<2x32xf32>
    %c0_21 = arith.constant 0 : index
    %c0_22 = arith.constant 0 : index
    %33 = vector.load %arg7[%c0_21, %c0_22] : memref<32x3xf32, #tpu.memory_space<vmem>>, vector<32x3xf32>
    %cst_23 = arith.constant dense<0.000000e+00> : vector<2x3xf32>
    %34 = tpu.matmul %32, %33, %cst_23 {dimension_numbers = #tpu.dot_dimension_numbers<[1], [0], [0], [1], [0, 0, 1, 1], [], []>} : vector<2x32xf32>, vector<32x3xf32>, vector<2x3xf32> -> vector<2x3xf32>
    %c0_24 = arith.constant 0 : index
    %c0_25 = arith.constant 0 : index
    %35 = vector.load %arg8[%c0_24, %c0_25] : memref<1x3xf32, #tpu.memory_space<vmem>>, vector<1x3xf32>
    %36 = vector.broadcast %35 : vector<1x3xf32> to vector<2x3xf32>
    %37 = arith.addf %34, %36 : vector<2x3xf32>
    %cst_26 = arith.constant 0.000000e+00 : f32
    %38 = vector.broadcast %cst_26 : f32 to vector<2x53xf32>
    %39 = tpu.concatenate %37, %21, %5, %22, %38 in 1 : vector<2x3xf32>, vector<2x32xf32>, vector<2x32xf32>, vector<2x8xf32>, vector<2x53xf32> -> vector<2x128xf32>
    %c0_27 = arith.constant 0 : index
    %c0_28 = arith.constant 0 : index
    %40 = vector.load %arg9[%c0_27, %c0_28] : memref<2x128xf32, #tpu.memory_space<vmem>>, vector<2x128xf32>
    tpu.vector_store %arg9[%c0_27, %c0_28], %39 {strides = array<i32>} : memref<2x128xf32, #tpu.memory_space<vmem>>, vector<2x128xf32>,
    return
  }
  func.func @transform_0(%arg0: i32) -> (i32, i32, i32) {
    %c0_i32 = arith.constant 0 : i32
    %c0_i32_0 = arith.constant 0 : i32
    %c0_i32_1 = arith.constant 0 : i32
    return %arg0, %c0_i32, %c0_i32_0 : i32, i32, i32
  }
  func.func @transform_1(%arg0: i32) -> (i32, i32) {
    %c0_i32 = arith.constant 0 : i32
    %c0_i32_0 = arith.constant 0 : i32
    return %arg0, %c0_i32 : i32, i32
  }
  func.func @transform_2(%arg0: i32) -> (i32, i32) {
    %c0_i32 = arith.constant 0 : i32
    %c0_i32_0 = arith.constant 0 : i32
    %c0_i32_1 = arith.constant 0 : i32
    return %c0_i32, %c0_i32_0 : i32, i32
  }
  func.func @transform_3(%arg0: i32) -> (i32, i32) {
    %c0_i32 = arith.constant 0 : i32
    %c0_i32_0 = arith.constant 0 : i32
    %c0_i32_1 = arith.constant 0 : i32
    return %c0_i32, %c0_i32_0 : i32, i32
  }
  func.func @transform_4(%arg0: i32) -> (i32, i32) {
    %c0_i32 = arith.constant 0 : i32
    %c0_i32_0 = arith.constant 0 : i32
    %c0_i32_1 = arith.constant 0 : i32
    return %c0_i32, %c0_i32_0 : i32, i32
  }
  func.func @transform_5(%arg0: i32) -> (i32, i32) {
    %c0_i32 = arith.constant 0 : i32
    %c0_i32_0 = arith.constant 0 : i32
    %c0_i32_1 = arith.constant 0 : i32
    return %c0_i32, %c0_i32_0 : i32, i32
  }
  func.func @transform_6(%arg0: i32) -> (i32, i32) {
    %c0_i32 = arith.constant 0 : i32
    %c0_i32_0 = arith.constant 0 : i32
    %c0_i32_1 = arith.constant 0 : i32
    return %c0_i32, %c0_i32_0 : i32, i32
  }
  func.func @transform_7(%arg0: i32) -> (i32, i32) {
    %c0_i32 = arith.constant 0 : i32
    %c0_i32_0 = arith.constant 0 : i32
    %c0_i32_1 = arith.constant 0 : i32
    return %c0_i32, %c0_i32_0 : i32, i32
  }
  func.func @transform_8(%arg0: i32) -> (i32, i32) {
    %c0_i32 = arith.constant 0 : i32
    %c0_i32_0 = arith.constant 0 : i32
    return %arg0, %c0_i32 : i32, i32
  }
}

</mosaic_0001>

<bundles_post_ra>
// kernel: tpu_custom_call.1
= control target key start
LH: loop header
LB: loop body
LE: loop exit
PB: predicated region body
PF: predicated region fallthrough
CT: control target
= control target key end

     0   :  { %13 = vsyncpa [#allocation3], 0  ;;  %s641_s0 = inlined_call_operand.hbm [shape: f32[2,8,32], index: 0, kind: input, shape index: {}]   ;;  %s642_s1 = inlined_call_operand.vmem [shape: f32[2,32], index: 1, kind: input, shape index: {}]   ;;  %s643_s2 = inlined_call_operand.vmem [shape: f32[32,32], index: 2, kind: input, shape index: {}]   ;;  %s644_s3 = inlined_call_operand.hbm [shape: f32[32,32], index: 3, kind: input, shape index: {}]   ;;  %s645_s4 = inlined_call_operand.hbm [shape: f32[32,32], index: 4, kind: input, shape index: {}]   ;;  %s646_s5 = inlined_call_operand.vmem [shape: f32[1,32], index: 5, kind: input, shape index: {}]   ;;  %s647_s6 = inlined_call_operand.vmem [shape: f32[32,3], index: 6, kind: input, shape index: {}]   ;;  %s648_s7 = inlined_call_operand.vmem [shape: f32[1,3], index: 7, kind: input, shape index: {}]   ;;  %s649_s8 = inlined_call_operand.hbm [shape: f32[2,128], index: 8, kind: output, shape index: {}]  }
   0x1   :  { %14 = vsyncpa [#allocation6], 0 }
   0x2   :  { %15 = vsyncpa [#allocation4], 0  ;;  %s37_s29 = sshll.u32 %s644_s3, 4  ;;  %s520_s30 = smov [#allocation5]   ;;  %s38_s29 = int_to_ptr.hbm [resolvable:$true] %s37_s29 }
   0x3   :  { %s39_s9 = sshll.u32 %s520_s30, 4  ;;  %s20_s12 = sshll.u32 %s641_s0, 4  ;;  %s40_s9 = int_to_ptr.vmem [resolvable:$true] %s39_s9  ;;  %s21_s12 = int_to_ptr.hbm [resolvable:$true] %s20_s12 }
   0x4   :  { %s521_s13 = smov 128   ;;  %s522_s14 = smov 8  }
   0x5   :  { %45 = dma.hbm_to_vmem [thread:$0]  %s38_s29, 512, %s40_s9, [#allocation6], %s521_s13, %s521_s13, %s522_s14  }
   0x6   :  { %s523_s15 = smov [#allocation2]   ;;  %s50_s19 = sshll.u32 %s645_s4, 4  ;;  %s51_s19 = int_to_ptr.hbm [resolvable:$true] %s50_s19 }
   0x7   :  { %s22_s16 = sshll.u32 %s523_s15, 4  ;;  %s524_s3 = smov [#allocation7]   ;;  %s23_s16 = int_to_ptr.vmem [resolvable:$true] %s22_s16 }
   0x8   :  { %28 = dma.hbm_to_vmem [thread:$0]  %s21_s12, 256, %s23_s16, [#allocation3], %s521_s13, %s521_s13, %s522_s14  }
   0x9   :  { %s52_s20 = sshll.u32 %s524_s3, 4  ;;  %s53_s20 = int_to_ptr.vmem [resolvable:$true] %s52_s20 }
   0xa   :  { %58 = dma.hbm_to_vmem [thread:$0]  %s51_s19, 512, %s53_s20, [#allocation6], %s521_s13, %s521_s13, %s522_s14  }
   0xb   :  { %514 = dma.done.wait [#allocation3], 256  }
   0xc   :  { %515 = vsyncadd [#allocation3], 4294967040 }
   0xd   :  { %516 = dma.done.wait [#allocation6], 1024  }
   0xe   :  { %517 = vsyncadd [#allocation6], 4294966272  ;;  %v83_v0 = vld [vmem:[%s643_s2 + $0x18] sm:$0xff]  ;;  %v82_v1 = vld [vmem:[%s643_s2 + $0x10] sm:$0xff]  ;;  %vm84_vm0 = vcmask 261120   ;;  %vm161_vm1 = vcmask 57344  }
   0xf   :  { %100 = vmatpush.msra.mxu0 %v83_v0  ;;  %v81_v2 = vld [vmem:[%s643_s2 + $0x8] sm:$0xff]  ;;  %v80_v3 = vld [vmem:[%s643_s2] sm:$0xff]  ;;  %v264_v9 = vld [vmem:[#allocation7 + $0x8] sm:$0xff]  ;;  %vm210_vm6 = vcmask 64512   ;;  %vm290_vm11 = vcmask 1041409   ;;  %s526_s2 = smov 3  }
  0x10   :  { %v79_v4 = vld [vmem:[%s642_s1] sm:$0x3]  ;;  %v78_v6 = vld [vmem:[#allocation2 + $0x8] sm:$0xff]  ;;  %v263_v10 = vld [vmem:[#allocation7] sm:$0xff]  ;;  %s525_s1 = smov 67   ;;  %s527_s29 = smov 35  }
  0x11   :  { %101 = vmatpush.msra.mxu0 %v82_v1  ;;  %v77_v5 = vld [vmem:[#allocation2] sm:$0xff]  ;;  %392 = vmatpush.xpose.msk.msra.mxu2 %vm84_vm0, %v78_v6  ;;  %v266_v7 = vld [vmem:[#allocation7 + $0x18] sm:$0xff]  ;;  %v260_v56 = vld [vmem:[#allocation5 + $0x8] sm:$0xff]  ;;  %vm362_vm12 = vcmask 23552   ;;  %vm364_vm13 = vcmask 285696   ;;  %vm366_vm14 = vcmask 547840  }
  0x12   :  { %390 = vmatpush.xpose.msk.msra.mxu1 %vm84_vm0, %v77_v5  ;;  %229 = vmatpush.msra.mxu3 %v77_v5  ;;  %v265_v8 = vld [vmem:[#allocation7 + $0x10] sm:$0xff]  ;;  %v262_v54 = vld [vmem:[#allocation5 + $0x18] sm:$0xff]  ;;  %v259_v57 = vld [vmem:[#allocation5] sm:$0xff]  ;;  %s378_s0 = sshll.u32 %s649_s8, 4  ;;  %vm368_vm15 = vcmask 613376   ;;  %s379_s0 = int_to_ptr.hbm [resolvable:$true] %s378_s0 }
  0x13   :  { %102 = vmatpush.msra.mxu0 %v81_v2  ;;  %v261_v55 = vld [vmem:[#allocation5 + $0x10] sm:$0xff]  ;;  %v323_v0 = vld [vmem:[%s647_s6 + $0x18] sm:$0xff]  ;;  %v322_v1 = vld [vmem:[%s647_s6 + $0x10] sm:$0xff] }
  0x14   :  { %252 = vmatpush.msrb.mxu3 %v78_v6  ;;  %v321_v2 = vld [vmem:[%s647_s6 + $0x8] sm:$0xff] }
  0x15   :  { %103 = vmatpush.msra.mxu0 %v80_v3  ;;  %306 = vmatpush.msrb.mxu2 %v262_v54  ;;  %v320_v3 = vld [vmem:[%s647_s6] sm:$0xff]  ;;  %s528_s6 = smov [#allocation8]  }
  0x16   :  { %389 = vmatmul.msk.f32.vlgmr.msra.gmra.mxu0 %vm84_vm0, %v79_v4  ;;  %279 = vmatpush.msrb.mxu1 %v266_v7  ;;  %v408_v4 = vld [vmem:[%s646_s5] ss:$0 sm:$0xff]  ;;  %s376_s3 = sshll.u32 %s528_s6, 4  ;;  %s377_s3 = int_to_ptr.vmem [resolvable:$true] %s376_s3 }
  0x17   :  { %307 = vmatpush.msrb.mxu2 %v261_v55  ;;  %343 = vmatpush.msrb.mxu0 %v323_v0 }
  0x18   :  { %280 = vmatpush.msrb.mxu1 %v265_v8 }
  0x19   :  { %308 = vmatpush.msrb.mxu2 %v260_v56  ;;  %344 = vmatpush.msrb.mxu0 %v322_v1 }
  0x1a   :  { %281 = vmatpush.msrb.mxu1 %v264_v9 }
  0x1b   :  { %309 = vmatpush.msrb.mxu2 %v259_v57  ;;  %345 = vmatpush.msrb.mxu0 %v321_v2 }
  0x1c   :  { %282 = vmatpush.msrb.mxu1 %v263_v10 }
  0x1d   :  { %346 = vmatpush.msrb.mxu0 %v320_v3 }
  0x93   :  { %v105_v11 = vpop.f32.mrf.mxu0 }
  0x94   :  { %v601_v12 = vmax.f32 %v105_v11, 0.0  ;;  %v409_v11 = vld [vmem:[%s648_s7] ss:$0 sm:$0xff] }
  0x96   :  { %391 = vmatmul.msk.f32.vlgmr.msra.gmra.mxu1 %vm84_vm0, %v601_v12  ;;  %v110_v13 = vrot.slane %v601_v12, 1 }
  0x98   :  { %393 = vmatmul.msk.f32.vlgmr.msra.gmra.mxu2 %vm84_vm0, %v110_v13 }
  0x9e   :  { %396 = vmatmul.msk.f32.vlgmr.msrb.gmra.mxu1 %vm84_vm0, %v601_v12 }
 0x113   :  { %v133_v14 = vpop.f32.mrf.mxu1 }
 0x114   :  { %v162_v15 = vsel %vm161_vm1, %v133_v14, -inf }
 0x115   :  { %163 = vmax.xlane.f32.xlu0 %v162_v15 }
 0x11b   :  { %v158_v16 = vpop.f32.mrf.mxu2  ;;  %v284_v5 = vpop.f32.mrf.mxu1 }
 0x11c   :  { %v165_v17 = vsel %vm161_vm1, %v158_v16, -inf }
 0x11d   :  { %166 = vmax.xlane.f32.xlu0 %v165_v17 }
 0x188   :  { %v164_v18 = vpop.xlane.xlu0 %163 }
 0x189   :  { %v168_v19 = vsub.f32 %v133_v14, %v164_v18 }
 0x18b   :  { %v170_v20 = vmul.f32 1.442695, %v168_v19 }
 0x18d   :  { %410 = vpow2.f32 %v170_v20 }
 0x190   :  { %v167_v21 = vpop.xlane.xlu0 %166 }
 0x191   :  { %v169_v22 = vsub.f32 %v158_v16, %v167_v21 }
 0x193   :  { %v411_v23 = vpop.eup %410  ;;  %v172_v24 = vmul.f32 1.442695, %v169_v22 }
 0x194   :  { %v174_v25 = vsel %vm161_vm1, %v411_v23, 0.0 }
 0x195   :  { %412 = vpow2.f32 %v172_v24  ;;  %175 = vadd.xlane.f32.xlu1 %v174_v25 }
 0x19b   :  { %v413_v26 = vpop.eup %412 }
 0x19c   :  { %v177_v27 = vsel %vm161_vm1, %v413_v26, 0.0 }
 0x19d   :  { %178 = vadd.xlane.f32.xlu1 %v177_v27 }
 0x208   :  { %v176_v28 = vpop.xlane.xlu1 %175 }
 0x209   :  { %414 = vrcp.f32 %v176_v28  ;;  %v191_v33 = vand.u32 2147483648, %v176_v28  ;;  %v189_v35 = vand.u32 2147483647, %v176_v28  ;;  %vm185_vm3 = vweird.f32 %v176_v28 }
 0x20b   :  { %v192_v38 = vor.u32 1.1754944e-38, %v191_v33  ;;  %vm190_vm5 = vcmp.eq.f32.partialorder %v189_v35, 8.507059e+37 }
 0x20f   :  { %v415_v29 = vpop.eup %414 }
 0x210   :  { %v181_v30 = vmul.f32 %v415_v29, %v176_v28  ;;  %v179_v31 = vpop.xlane.xlu1 %178  ;;  %vm186_vm2 = vweird.f32 %v415_v29 }
 0x211   :  { %416 = vrcp.f32 %v179_v31  ;;  %vm187_vm4 = vmor %vm185_vm3, %vm186_vm2  ;;  %v205_v44 = vand.u32 2147483648, %v179_v31  ;;  %v203_v46 = vand.u32 2147483647, %v179_v31  ;;  %vm199_vm8 = vweird.f32 %v179_v31 }
 0x212   :  { %v182_v32 = vsub.f32 1.0, %v181_v30 }
 0x213   :  { %v206_v48 = vor.u32 1.1754944e-38, %v205_v44  ;;  %vm204_vm10 = vcmp.eq.f32.partialorder %v203_v46, 8.507059e+37 }
 0x214   :  { %v183_v34 = vmul.f32 %v415_v29, %v182_v32 }
 0x216   :  { %v184_v36 = vadd.f32 %v415_v29, %v183_v34 }
 0x217   :  { %v417_v37 = vpop.eup %416 }
 0x218   :  { %v195_v39 = vmul.f32 %v417_v37, %v179_v31  ;;  %v188_v40 = vsel %vm187_vm4, %v415_v29, %v184_v36  ;;  %vm200_vm7 = vweird.f32 %v417_v37 }
 0x219   :  { %v193_v41 = vsel %vm190_vm5, %v192_v38, %v188_v40  ;;  %vm201_vm9 = vmor %vm199_vm8, %vm200_vm7 }
 0x21a   :  { %v196_v42 = vsub.f32 1.0, %v195_v39  ;;  %v208_v43 = vmul.f32 %v411_v23, %v193_v41 }
 0x21c   :  { %v197_v45 = vmul.f32 %v417_v37, %v196_v42  ;;  %394 = vmatmul.msk.f32.vlgmr.msra.gmra.mxu3 %vm210_vm6, %v208_v43 }
 0x21e   :  { %v198_v47 = vadd.f32 %v417_v37, %v197_v45 }
 0x220   :  { %v202_v49 = vsel %vm201_vm9, %v417_v37, %v198_v47 }
 0x221   :  { %v207_v50 = vsel %vm204_vm10, %v206_v48, %v202_v49 }
 0x222   :  { %v209_v51 = vmul.f32 %v413_v26, %v207_v50 }
 0x224   :  { %395 = vmatmul.msk.f32.vlgmr.msrb.gmra.mxu3 %vm210_vm6, %v209_v51  ;;  %v357_v52 = vrot.slane %v209_v51, 7 }
 0x226   :  { %v358_v53 = vsel %vm290_vm11, %v357_v52, %v208_v43 }
 0x227   :  { %359 = vrot.lane.b32.xlu0 %v358_v53, %s525_s1 }
 0x299   :  { %v360_v16 = vpop.permute.xlu0 %359 }
 0x29f   :  { %v231_v58 = vpop.f32.mrf.mxu3 }
 0x2a0   :  { %v257_v61 = vmul.f32 0.125, %v231_v58 }
 0x2a7   :  { %v254_v59 = vpop.f32.mrf.mxu3 }
 0x2a8   :  { %v258_v60 = vmul.f32 0.125, %v254_v59 }
 0x2aa   :  { %v289_v62 = vrot.slane %v258_v60, 7 }
 0x2ac   :  { %v291_v63 = vsel %vm290_vm11, %v289_v62, %v257_v61 }
 0x2ad   :  { %351 = vrot.lane.b32.xlu2 %v291_v63, %s526_s2  ;;  %397 = vmatmul.msk.f32.vlgmr.msrb.gmra.mxu2 %vm84_vm0, %v291_v63 }
 0x2b5   :  { %354 = vrot.lane.b32.xlu2 %v601_v12, %s527_s29 }
 0x307   :  { %v352_v10 = vpop.permute.xlu2 %351 }
 0x30f   :  { %v355_v14 = vpop.permute.xlu2 %354 }
 0x330   :  { %v311_v6 = vpop.f32.mrf.mxu2 }
 0x331   :  { %v312_v7 = vadd.f32 %v311_v6, %v284_v5 }
 0x333   :  { %v318_v8 = vadd.f32 %v408_v4, %v312_v7 }
 0x335   :  { %v319_v9 = vmax.f32 %v318_v8, 0.0 }
 0x337   :  { %398 = vmatmul.msk.f32.vlgmr.msrb.gmra.mxu0 %vm84_vm0, %v319_v9 }
 0x3b4   :  { %v348_v12 = vpop.f32.mrf.mxu0 }
 0x3b5   :  { %v349_v13 = vadd.f32 %v409_v11, %v348_v12 }
 0x3b7   :  { %v363_v15 = vsel %vm362_vm12, %v349_v13, %v352_v10 }
 0x3b8   :  { %v365_v17 = vsel %vm364_vm13, %v363_v15, %v355_v14 }
 0x3b9   :  { %v367_v18 = vsel %vm366_vm14, %v365_v17, %v360_v16 }
 0x3ba   :  { %v369_v19 = vsel %vm368_vm15, %v367_v18, 0.0 }
 0x3bb   :  { %370 = vst [vmem:[#allocation8] sm:$0x3] %v369_v19 }
 0x3bc   :  { %381 = dma.vmem_to_hbm [thread:$0]  %s377_s3, 32, %s379_s0, [#allocation4]  }
 0x3bd   :  { %518 = dma.done.wait [#allocation4], 32  }
 0x3be   :  { %519 = vsyncadd [#allocation4], 4294967264 }
 0x3bf   :  { %386 = vsyncpa [#allocation3], 1 }
 0x3c0   :  { %387 = vsyncpa [#allocation6], 1 }
 0x3c1   :  { %388 = vsyncpa [#allocation4], 1 }

</bundles_post_ra>
